<compile_context>
chip_gen: v5e
topology: v5e:2x2
jax: 0.10.0
libtpu: 0.0.40
codegen_flags: <defaults>
</compile_context>

<pallas_src>
import functools

import jax
import jax.numpy as jnp
from jax.experimental import pallas as pl
from jax.experimental.pallas import tpu as pltpu

LANE = 128
MAX_TILE = 1024          # upper bound on batch-tile rows (VMEM stays << limits)


def _round_up(n: int, m: int) -> int:
    return ((n + m - 1) // m) * m


def _cdiv(a: int, b: int) -> int:
    return -(-a // b)


# --------------------------------------------------------------------------
# Kernel
# --------------------------------------------------------------------------
def _qnetwork_kernel(x_ref,
                     w1_ref, b1_ref,
                     w2_ref, b2_ref,
                     w3_ref, b3_ref,
                     w4_ref, b4_ref,
                     w5_ref, b5_ref,
                     out_ref):
    """Fused forward for one batch tile: relu(fc1..fc4) chain, linear fc5."""
    # In-kernel cast of the raw f32 state to bf16; K of fc1 stays state_size.
    h = x_ref[...].astype(jnp.bfloat16)

    def hidden(h_bf16, w_ref, b_ref):
        acc = jnp.dot(h_bf16, w_ref[...], preferred_element_type=jnp.float32)
        acc = acc + b_ref[...]                       # f32 bias add
        # bf16 ReLU + downcast in one pass (identical to f32 max then cast).
        return jnp.maximum(acc.astype(jnp.bfloat16), 0)

    h = hidden(h, w1_ref, b1_ref)
    h = hidden(h, w2_ref, b2_ref)
    h = hidden(h, w3_ref, b3_ref)
    h = hidden(h, w4_ref, b4_ref)

    out = jnp.dot(h, w5_ref[...], preferred_element_type=jnp.float32)
    out = out + b5_ref[...]
    out_ref[...] = out.astype(out_ref.dtype)


# --------------------------------------------------------------------------
# Tiling policy
# --------------------------------------------------------------------------
def _choose_tiling(B: int):
    """Return (TB, B_pad).

    B <= 256: a single full-array tile (TB == B_pad == B) -> no wrapper pad,
              no wrapper cast; blocks equal full array dims so always legal.
    B  > 256: >= 2 equal tiles (v7x has 2 TensorCores), each <= MAX_TILE rows
              and a multiple of 16 (bf16 sublane pack), with minimal padding.
    """
    if B <= 256:
        return B, B
    b16 = _round_up(B, 16)
    n_steps = max(2, _cdiv(b16, MAX_TILE))
    tb = _round_up(_cdiv(b16, n_steps), 16)
    return tb, tb * n_steps


# --------------------------------------------------------------------------
# Wrapper
# --------------------------------------------------------------------------
@functools.partial(jax.jit, static_argnames=("action_size",))
def qnetwork_forward(state, params, *, action_size):
    """state: (B, state_size) f32.  params: bf16 padded weights + f32 biases."""
    B, state_size = state.shape
    assert params["w1"].shape[0] == state_size
    out_pad = params["w5"].shape[1]

    TB, B_pad = _choose_tiling(B)

    x = state
    if B_pad != B:
        x = jnp.pad(x, ((0, B_pad - B), (0, 0)))   # only hit on the large-B path

    weight_args = (
        params["w1"], params["b1"],
        params["w2"], params["b2"],
        params["w3"], params["b3"],
        params["w4"], params["b4"],
        params["w5"], params["b5"],
    )

    grid = (B_pad // TB,)
    # Activation tile: last dim equals the full array dim (state_size), so the
    # (8,128) divisibility rule is satisfied without lane padding.
    in_specs = [pl.BlockSpec((TB, state_size), lambda i: (i, 0))]
    # Weights/biases: full-array block, constant index_map -> resident in VMEM
    # across all batch-grid steps.
    in_specs += [pl.BlockSpec(a.shape, lambda i: (0, 0)) for a in weight_args]
    out_spec = pl.BlockSpec((TB, out_pad), lambda i: (i, 0))

    flops = 2 * B_pad * sum(
        params[f"w{l}"].shape[0] * params[f"w{l}"].shape[1] for l in range(1, 6))
    bytes_accessed = (x.size * x.dtype.itemsize
                      + sum(a.size * a.dtype.itemsize for a in weight_args)
                      + B_pad * out_pad * 4)

    out = pl.pallas_call(
        _qnetwork_kernel,
        out_shape=jax.ShapeDtypeStruct((B_pad, out_pad), jnp.float32),
        grid=grid,
        in_specs=in_specs,
        out_specs=out_spec,
        compiler_params=pltpu.CompilerParams(
            dimension_semantics=("parallel",)),
        cost_estimate=pl.CostEstimate(
            flops=flops, transcendentals=0, bytes_accessed=bytes_accessed),
    )(x, *weight_args)

    # Drop batch padding (if any) and the lane padding of the final layer.
    return out[:B, :action_size]


# --------------------------------------------------------------------------
# Parameter init (PyTorch nn.Linear default: U(-1/sqrt(fan_in), 1/sqrt(fan_in)))
# --------------------------------------------------------------------------
def init_qnetwork_params(key, state_size, action_size):
    """Returns (kernel_params, ref_params).

    kernel_params: weights transposed to (in, out); fc1's K axis unpadded,
                   every other in/out dim zero-padded to a multiple of 128;
                   weights bf16, biases (1, out_pad) f32.
    ref_params:    unpadded f32 copies for the pure-JAX reference.
    """
    dims = [(state_size, 150), (150, 150), (150, 60), (60, 60), (60, action_size)]
    kernel_params, ref_params = {}, {}
    for i, (fan_in, fan_out) in enumerate(dims, start=1):
        key, kw, kb = jax.random.split(key, 3)
        bound = 1.0 / (fan_in ** 0.5)
        w = jax.random.uniform(kw, (fan_in, fan_out), jnp.float32, -bound, bound)
        b = jax.random.uniform(kb, (fan_out,), jnp.float32, -bound, bound)
        ref_params[f"w{i}"] = w
        ref_params[f"b{i}"] = b

        in_p = fan_in if i == 1 else _round_up(fan_in, LANE)   # fc1 K unpadded
        out_p = _round_up(fan_out, LANE)
        w_p = jnp.zeros((in_p, out_p), jnp.float32).at[:fan_in, :fan_out].set(w)
        b_p = jnp.zeros((1, out_p), jnp.float32).at[0, :fan_out].set(b)
        kernel_params[f"w{i}"] = w_p.astype(jnp.bfloat16)
        kernel_params[f"b{i}"] = b_p        # f32 bias; padded lanes exactly zero
    return kernel_params, ref_params


# --------------------------------------------------------------------------
# References
# --------------------------------------------------------------------------
def qnetwork_reference_f32(state, ref_params):
    """Full-precision reference matching the original PyTorch module."""
    h = state
    for i in range(1, 5):
        h = jax.nn.relu(h @ ref_params[f"w{i}"] + ref_params[f"b{i}"])
    return h @ ref_params["w5"] + ref_params["b5"]


def qnetwork_reference_bf16(state, kernel_params, action_size):
    """Pure-JAX replica of exactly what the kernel computes (bf16 weights /
    activations into the MXU, f32 accumulate + bias, bf16 ReLU epilogue)."""
    h = state.astype(jnp.bfloat16)
    for i in range(1, 5):
        acc = jnp.dot(h, kernel_params[f"w{i}"],
                      preferred_element_type=jnp.float32) + kernel_params[f"b{i}"]
        h = jnp.maximum(acc.astype(jnp.bfloat16), 0)
    out = jnp.dot(h, kernel_params["w5"],
                  preferred_element_type=jnp.float32) + kernel_params["b5"]
    return out[:, :action_size]


# --------------------------------------------------------------------------
if __name__ == "__main__":
    key = jax.random.PRNGKey(0)
    state_size = 8
    action_size = 4
    batch = 2

    key, k_params, k_state = jax.random.split(key, 3)
    kernel_params, ref_params = init_qnetwork_params(k_params, state_size, action_size)
    state = jax.random.normal(k_state, (batch, state_size), jnp.float32)

    # Small-batch (single-tile, zero wrapper-op) path.
    out = qnetwork_forward(state, kernel_params, action_size=action_size)
    out = jax.block_until_ready(out)
    assert out.shape == (batch, action_size), out.shape

    # Tight check against a pure-JAX replica of the kernel's bf16 math.
    ref_exact = qnetwork_reference_bf16(state, kernel_params, action_size)
    assert jnp.allclose(out, ref_exact, atol=1e-2, rtol=1e-2), (out, ref_exact)

    # Looser check against the full-f32 PyTorch-equivalent forward
    # (difference is only bf16 weight/activation storage).
    ref_f32 = qnetwork_reference_f32(state, ref_params)
    assert jnp.allclose(out, ref_f32, atol=1e-1, rtol=1e-1), (out, ref_f32)

    # Also exercise the large-batch multi-tile path (grid > 1, batch padding).
    key, k_big = jax.random.split(key)
    big_state = jax.random.normal(k_big, (300, state_size), jnp.float32)
    out_big = jax.block_until_ready(
        qnetwork_forward(big_state, kernel_params, action_size=action_size))
    assert out_big.shape == (300, action_size), out_big.shape
    ref_big = qnetwork_reference_bf16(big_state, kernel_params, action_size)
    assert jnp.allclose(out_big, ref_big, atol=1e-2, rtol=1e-2)

    print("KERNEL_OK")
</pallas_src>

<mosaic_0001>
module attributes {stable_mosaic.version = 11 : i64} {
  func.func @_qnetwork_kernel(%arg0: i32, %arg1: memref<2x8xf32, #tpu.memory_space<vmem>>, %arg2: memref<8x256xbf16, #tpu.memory_space<vmem>>, %arg3: memref<1x256xf32, #tpu.memory_space<vmem>>, %arg4: memref<256x256xbf16, #tpu.memory_space<vmem>>, %arg5: memref<1x256xf32, #tpu.memory_space<vmem>>, %arg6: memref<256x128xbf16, #tpu.memory_space<vmem>>, %arg7: memref<1x128xf32, #tpu.memory_space<vmem>>, %arg8: memref<128x128xbf16, #tpu.memory_space<vmem>>, %arg9: memref<1x128xf32, #tpu.memory_space<vmem>>, %arg10: memref<128x128xbf16, #tpu.memory_space<vmem>>, %arg11: memref<1x128xf32, #tpu.memory_space<vmem>>, %arg12: memref<2x128xf32, #tpu.memory_space<vmem>>) attributes {dimension_semantics = [#tpu.dimension_semantics<parallel>], iteration_bounds = array<i64: 1>, scalar_prefetch = 0 : i64, scratch_operands = 0 : i64, tpu.core_type = #tpu.core_type<tc>, window_params = [{transform_indices = @transform_0, window_bounds = array<i64: 2, 8>}, {pipeline_mode = #tpu.pipeline_mode<synchronous>, transform_indices = @transform_1, window_bounds = array<i64: 8, 256>}, {pipeline_mode = #tpu.pipeline_mode<synchronous>, transform_indices = @transform_2, window_bounds = array<i64: 1, 256>}, {pipeline_mode = #tpu.pipeline_mode<synchronous>, transform_indices = @transform_3, window_bounds = array<i64: 256, 256>}, {pipeline_mode = #tpu.pipeline_mode<synchronous>, transform_indices = @transform_4, window_bounds = array<i64: 1, 256>}, {pipeline_mode = #tpu.pipeline_mode<synchronous>, transform_indices = @transform_5, window_bounds = array<i64: 256, 128>}, {pipeline_mode = #tpu.pipeline_mode<synchronous>, transform_indices = @transform_6, window_bounds = array<i64: 1, 128>}, {pipeline_mode = #tpu.pipeline_mode<synchronous>, transform_indices = @transform_7, window_bounds = array<i64: 128, 128>}, {pipeline_mode = #tpu.pipeline_mode<synchronous>, transform_indices = @transform_8, window_bounds = array<i64: 1, 128>}, {pipeline_mode = #tpu.pipeline_mode<synchronous>, transform_indices = @transform_9, window_bounds = array<i64: 128, 128>}, {pipeline_mode = #tpu.pipeline_mode<synchronous>, transform_indices = @transform_10, window_bounds = array<i64: 1, 128>}, {transform_indices = @transform_11, window_bounds = array<i64: 2, 128>}]} {
    %c0 = arith.constant 0 : index
    %c0_0 = arith.constant 0 : index
    %0 = vector.load %arg1[%c0, %c0_0] : memref<2x8xf32, #tpu.memory_space<vmem>>, vector<2x8xf32>
    %1 = arith.truncf %0 : vector<2x8xf32> to vector<2x8xbf16>
    %c0_1 = arith.constant 0 : index
    %c0_2 = arith.constant 0 : index
    %2 = vector.load %arg2[%c0_1, %c0_2] : memref<8x256xbf16, #tpu.memory_space<vmem>>, vector<8x256xbf16>
    %cst = arith.constant dense<0.000000e+00> : vector<2x256xf32>
    %3 = tpu.matmul %1, %2, %cst {dimension_numbers = #tpu.dot_dimension_numbers<[1], [0], [0], [1], [0, 0, 1, 1], [], []>} : vector<2x8xbf16>, vector<8x256xbf16>, vector<2x256xf32> -> vector<2x256xf32>
    %c0_3 = arith.constant 0 : index
    %c0_4 = arith.constant 0 : index
    %4 = vector.load %arg3[%c0_3, %c0_4] : memref<1x256xf32, #tpu.memory_space<vmem>>, vector<1x256xf32>
    %5 = vector.broadcast %4 : vector<1x256xf32> to vector<2x256xf32>
    %6 = arith.addf %3, %5 : vector<2x256xf32>
    %7 = arith.truncf %6 : vector<2x256xf32> to vector<2x256xbf16>
    %cst_5 = arith.constant 0.000000e+00 : bf16
    %8 = vector.broadcast %cst_5 : bf16 to vector<2x256xbf16>
    %9 = arith.maximumf %7, %8 : vector<2x256xbf16>
    %c0_6 = arith.constant 0 : index
    %c0_7 = arith.constant 0 : index
    %10 = vector.load %arg4[%c0_6, %c0_7] : memref<256x256xbf16, #tpu.memory_space<vmem>>, vector<256x256xbf16>
    %cst_8 = arith.constant dense<0.000000e+00> : vector<2x256xf32>
    %11 = tpu.matmul %9, %10, %cst_8 {dimension_numbers = #tpu.dot_dimension_numbers<[1], [0], [0], [1], [0, 0, 1, 1], [], []>} : vector<2x256xbf16>, vector<256x256xbf16>, vector<2x256xf32> -> vector<2x256xf32>
    %c0_9 = arith.constant 0 : index
    %c0_10 = arith.constant 0 : index
    %12 = vector.load %arg5[%c0_9, %c0_10] : memref<1x256xf32, #tpu.memory_space<vmem>>, vector<1x256xf32>
    %13 = vector.broadcast %12 : vector<1x256xf32> to vector<2x256xf32>
    %14 = arith.addf %11, %13 : vector<2x256xf32>
    %15 = arith.truncf %14 : vector<2x256xf32> to vector<2x256xbf16>
    %cst_11 = arith.constant 0.000000e+00 : bf16
    %16 = vector.broadcast %cst_11 : bf16 to vector<2x256xbf16>
    %17 = arith.maximumf %15, %16 : vector<2x256xbf16>
    %c0_12 = arith.constant 0 : index
    %c0_13 = arith.constant 0 : index
    %18 = vector.load %arg6[%c0_12, %c0_13] : memref<256x128xbf16, #tpu.memory_space<vmem>>, vector<256x128xbf16>
    %cst_14 = arith.constant dense<0.000000e+00> : vector<2x128xf32>
    %19 = tpu.matmul %17, %18, %cst_14 {dimension_numbers = #tpu.dot_dimension_numbers<[1], [0], [0], [1], [0, 0, 1, 1], [], []>} : vector<2x256xbf16>, vector<256x128xbf16>, vector<2x128xf32> -> vector<2x128xf32>
    %c0_15 = arith.constant 0 : index
    %c0_16 = arith.constant 0 : index
    %20 = vector.load %arg7[%c0_15, %c0_16] : memref<1x128xf32, #tpu.memory_space<vmem>>, vector<1x128xf32>
    %21 = vector.broadcast %20 : vector<1x128xf32> to vector<2x128xf32>
    %22 = arith.addf %19, %21 : vector<2x128xf32>
    %23 = arith.truncf %22 : vector<2x128xf32> to vector<2x128xbf16>
    %cst_17 = arith.constant 0.000000e+00 : bf16
    %24 = vector.broadcast %cst_17 : bf16 to vector<2x128xbf16>
    %25 = arith.maximumf %23, %24 : vector<2x128xbf16>
    %c0_18 = arith.constant 0 : index
    %c0_19 = arith.constant 0 : index
    %26 = vector.load %arg8[%c0_18, %c0_19] : memref<128x128xbf16, #tpu.memory_space<vmem>>, vector<128x128xbf16>
    %cst_20 = arith.constant dense<0.000000e+00> : vector<2x128xf32>
    %27 = tpu.matmul %25, %26, %cst_20 {dimension_numbers = #tpu.dot_dimension_numbers<[1], [0], [0], [1], [0, 0, 1, 1], [], []>} : vector<2x128xbf16>, vector<128x128xbf16>, vector<2x128xf32> -> vector<2x128xf32>
    %c0_21 = arith.constant 0 : index
    %c0_22 = arith.constant 0 : index
    %28 = vector.load %arg9[%c0_21, %c0_22] : memref<1x128xf32, #tpu.memory_space<vmem>>, vector<1x128xf32>
    %29 = vector.broadcast %28 : vector<1x128xf32> to vector<2x128xf32>
    %30 = arith.addf %27, %29 : vector<2x128xf32>
    %31 = arith.truncf %30 : vector<2x128xf32> to vector<2x128xbf16>
    %cst_23 = arith.constant 0.000000e+00 : bf16
    %32 = vector.broadcast %cst_23 : bf16 to vector<2x128xbf16>
    %33 = arith.maximumf %31, %32 : vector<2x128xbf16>
    %c0_24 = arith.constant 0 : index
    %c0_25 = arith.constant 0 : index
    %34 = vector.load %arg10[%c0_24, %c0_25] : memref<128x128xbf16, #tpu.memory_space<vmem>>, vector<128x128xbf16>
    %cst_26 = arith.constant dense<0.000000e+00> : vector<2x128xf32>
    %35 = tpu.matmul %33, %34, %cst_26 {dimension_numbers = #tpu.dot_dimension_numbers<[1], [0], [0], [1], [0, 0, 1, 1], [], []>} : vector<2x128xbf16>, vector<128x128xbf16>, vector<2x128xf32> -> vector<2x128xf32>
    %c0_27 = arith.constant 0 : index
    %c0_28 = arith.constant 0 : index
    %36 = vector.load %arg11[%c0_27, %c0_28] : memref<1x128xf32, #tpu.memory_space<vmem>>, vector<1x128xf32>
    %37 = vector.broadcast %36 : vector<1x128xf32> to vector<2x128xf32>
    %38 = arith.addf %35, %37 : vector<2x128xf32>
    %c0_29 = arith.constant 0 : index
    %c0_30 = arith.constant 0 : index
    %39 = vector.load %arg12[%c0_29, %c0_30] : memref<2x128xf32, #tpu.memory_space<vmem>>, vector<2x128xf32>
    tpu.vector_store %arg12[%c0_29, %c0_30], %38 {strides = array<i32>} : memref<2x128xf32, #tpu.memory_space<vmem>>, vector<2x128xf32>,
    return
  }
  func.func @transform_0(%arg0: i32) -> (i32, i32) {
    %c0_i32 = arith.constant 0 : i32
    %c0_i32_0 = arith.constant 0 : i32
    return %arg0, %c0_i32 : i32, i32
  }
  func.func @transform_1(%arg0: i32) -> (i32, i32) {
    %c0_i32 = arith.constant 0 : i32
    %c0_i32_0 = arith.constant 0 : i32
    %c0_i32_1 = arith.constant 0 : i32
    return %c0_i32, %c0_i32_0 : i32, i32
  }
  func.func @transform_2(%arg0: i32) -> (i32, i32) {
    %c0_i32 = arith.constant 0 : i32
    %c0_i32_0 = arith.constant 0 : i32
    %c0_i32_1 = arith.constant 0 : i32
    return %c0_i32, %c0_i32_0 : i32, i32
  }
  func.func @transform_3(%arg0: i32) -> (i32, i32) {
    %c0_i32 = arith.constant 0 : i32
    %c0_i32_0 = arith.constant 0 : i32
    %c0_i32_1 = arith.constant 0 : i32
    return %c0_i32, %c0_i32_0 : i32, i32
  }
  func.func @transform_4(%arg0: i32) -> (i32, i32) {
    %c0_i32 = arith.constant 0 : i32
    %c0_i32_0 = arith.constant 0 : i32
    %c0_i32_1 = arith.constant 0 : i32
    return %c0_i32, %c0_i32_0 : i32, i32
  }
  func.func @transform_5(%arg0: i32) -> (i32, i32) {
    %c0_i32 = arith.constant 0 : i32
    %c0_i32_0 = arith.constant 0 : i32
    %c0_i32_1 = arith.constant 0 : i32
    return %c0_i32, %c0_i32_0 : i32, i32
  }
  func.func @transform_6(%arg0: i32) -> (i32, i32) {
    %c0_i32 = arith.constant 0 : i32
    %c0_i32_0 = arith.constant 0 : i32
    %c0_i32_1 = arith.constant 0 : i32
    return %c0_i32, %c0_i32_0 : i32, i32
  }
  func.func @transform_7(%arg0: i32) -> (i32, i32) {
    %c0_i32 = arith.constant 0 : i32
    %c0_i32_0 = arith.constant 0 : i32
    %c0_i32_1 = arith.constant 0 : i32
    return %c0_i32, %c0_i32_0 : i32, i32
  }
  func.func @transform_8(%arg0: i32) -> (i32, i32) {
    %c0_i32 = arith.constant 0 : i32
    %c0_i32_0 = arith.constant 0 : i32
    %c0_i32_1 = arith.constant 0 : i32
    return %c0_i32, %c0_i32_0 : i32, i32
  }
  func.func @transform_9(%arg0: i32) -> (i32, i32) {
    %c0_i32 = arith.constant 0 : i32
    %c0_i32_0 = arith.constant 0 : i32
    %c0_i32_1 = arith.constant 0 : i32
    return %c0_i32, %c0_i32_0 : i32, i32
  }
  func.func @transform_10(%arg0: i32) -> (i32, i32) {
    %c0_i32 = arith.constant 0 : i32
    %c0_i32_0 = arith.constant 0 : i32
    %c0_i32_1 = arith.constant 0 : i32
    return %c0_i32, %c0_i32_0 : i32, i32
  }
  func.func @transform_11(%arg0: i32) -> (i32, i32) {
    %c0_i32 = arith.constant 0 : i32
    %c0_i32_0 = arith.constant 0 : i32
    return %arg0, %c0_i32 : i32, i32
  }
}

</mosaic_0001>

<bundles_post_ra>
// kernel: qnetwork_forward.1
= control target key start
LH: loop header
LB: loop body
LE: loop exit
PB: predicated region body
PF: predicated region fallthrough
CT: control target
= control target key end

     0   :  { %16 = vsyncpa [#allocation3], 0  ;;  %s1510_s0 = inlined_call_operand.hbm [shape: f32[2,8], index: 0, kind: input, shape index: {}]   ;;  %s1511_s1 = inlined_call_operand.hbm [shape: bf16[8,256], index: 1, kind: input, shape index: {}]   ;;  %s1512_s2 = inlined_call_operand.hbm [shape: f32[1,256], index: 2, kind: input, shape index: {}]   ;;  %s1513_s3 = inlined_call_operand.hbm [shape: bf16[256,256], index: 3, kind: input, shape index: {}]   ;;  %s1514_s4 = inlined_call_operand.hbm [shape: f32[1,256], index: 4, kind: input, shape index: {}]   ;;  %s1515_s5 = inlined_call_operand.hbm [shape: bf16[256,128], index: 5, kind: input, shape index: {}]   ;;  %s1516_s6 = inlined_call_operand.vmem [shape: f32[1,128], index: 6, kind: input, shape index: {}]   ;;  %s1517_s7 = inlined_call_operand.hbm [shape: bf16[128,128], index: 7, kind: input, shape index: {}]   ;;  %s1518_s8 = inlined_call_operand.vmem [shape: f32[1,128], index: 8, kind: input, shape index: {}]   ;;  %s1519_s9 = inlined_call_operand.hbm [shape: bf16[128,128], index: 9, kind: input, shape index: {}]   ;;  %s1520_s10 = inlined_call_operand.vmem [shape: f32[1,128], index: 10, kind: input, shape index: {}]   ;;  %s1521_s11 = inlined_call_operand.hbm [shape: f32[2,128], index: 11, kind: output, shape index: {}]  }
   0x1   :  { %17 = vsyncpa [#allocation6], 0 }
   0x2   :  { %18 = vsyncpa [#allocation9], 0 }
   0x3   :  { %19 = vsyncpa [#allocation12], 0 }
   0x4   :  { %20 = vsyncpa [#allocation15], 0  ;;  %s38_s19 = sshll.u32 %s1511_s1, 4  ;;  %s39_s19 = int_to_ptr.hbm [resolvable:$true] %s38_s19 }
   0x5   :  { %21 = vsyncpa [#allocation4], 0  ;;  %s1388_s20 = smov [#allocation5]   ;;  %s59_s24 = sshll.u32 %s1513_s3, 4  ;;  %s60_s24 = int_to_ptr.hbm [resolvable:$true] %s59_s24 }
   0x6   :  { %s40_s21 = sshll.u32 %s1388_s20, 4  ;;  %s1389_s25 = smov [#allocation8]   ;;  %s41_s21 = int_to_ptr.vmem [resolvable:$true] %s40_s21 }
   0x7   :  { %43 = dma.hbm_to_vmem [thread:$0]  %s39_s19, 128, %s41_s21, [#allocation6]  }
   0x8   :  { %s61_s26 = sshll.u32 %s1389_s25, 4  ;;  %s1390_s27 = smov 128   ;;  %s62_s26 = int_to_ptr.vmem [resolvable:$true] %s61_s26 }
   0x9   :  { %s1391_s28 = smov 8   ;;  %s83_s1 = sshll.u32 %s1515_s5, 4  ;;  %s84_s1 = int_to_ptr.hbm [resolvable:$true] %s83_s1 }
   0xa   :  { %67 = dma.hbm_to_vmem [thread:$0]  %s60_s24, 4096, %s62_s26, [#allocation9], %s1390_s27, %s1390_s27, %s1391_s28  }
   0xb   :  { %s1392_s12 = smov [#allocation11]   ;;  %s27_s3 = sshll.u32 %s1510_s0, 4  ;;  %s28_s3 = int_to_ptr.hbm [resolvable:$true] %s27_s3 }
   0xc   :  { %s85_s13 = sshll.u32 %s1392_s12, 4  ;;  %s1393_s16 = smov 64   ;;  %s86_s13 = int_to_ptr.vmem [resolvable:$true] %s85_s13 }
   0xd   :  { %s1394_s17 = smov 4   ;;  %s1395_s18 = smov [#allocation2]  }
   0xe   :  { %91 = dma.hbm_to_vmem [thread:$0]  %s84_s1, 2048, %s86_s13, [#allocation12], %s1393_s16, %s1393_s16, %s1394_s17  }
   0xf   :  { %s29_s19 = sshll.u32 %s1395_s18, 4  ;;  %s49_s5 = sshll.u32 %s1512_s2, 4  ;;  %s30_s19 = int_to_ptr.vmem [resolvable:$true] %s29_s19  ;;  %s50_s5 = int_to_ptr.hbm [resolvable:$true] %s49_s5 }
  0x10   :  { %32 = dma.hbm_to_vmem [thread:$0]  %s28_s3, 32, %s30_s19, [#allocation3]  }
  0x11   :  { %s73_s0 = sshll.u32 %s1514_s4, 4  ;;  %s1396_s24 = smov [#allocation7]   ;;  %s74_s0 = int_to_ptr.hbm [resolvable:$true] %s73_s0 }
  0x12   :  { %s51_s25 = sshll.u32 %s1396_s24, 4  ;;  %s1397_s26 = smov [#allocation10]   ;;  %s52_s25 = int_to_ptr.vmem [resolvable:$true] %s51_s25 }
  0x13   :  { %54 = dma.hbm_to_vmem [thread:$0]  %s50_s5, 32, %s52_s25, [#allocation6]  }
  0x14   :  { %s75_s27 = sshll.u32 %s1397_s26, 4  ;;  %s98_s30 = sshll.u32 %s1517_s7, 4  ;;  %s76_s27 = int_to_ptr.vmem [resolvable:$true] %s75_s27  ;;  %s99_s30 = int_to_ptr.hbm [resolvable:$true] %s98_s30 }
  0x15   :  { %78 = dma.hbm_to_vmem [thread:$0]  %s74_s0, 32, %s76_s27, [#allocation9]  }
  0x16   :  { %s113_s12 = sshll.u32 %s1519_s9, 4  ;;  %s1398_s13 = smov [#allocation13]   ;;  %s114_s12 = int_to_ptr.hbm [resolvable:$true] %s113_s12 }
  0x17   :  { %s100_s4 = sshll.u32 %s1398_s13, 4  ;;  %s1399_s14 = smov [#allocation14]   ;;  %s101_s4 = int_to_ptr.vmem [resolvable:$true] %s100_s4 }
  0x18   :  { %106 = dma.hbm_to_vmem [thread:$0]  %s99_s30, 1024, %s101_s4, [#allocation12], %s1393_s16, %s1393_s16, %s1394_s17  }
  0x19   :  { %s115_s15 = sshll.u32 %s1399_s14, 4  ;;  %s116_s15 = int_to_ptr.vmem [resolvable:$true] %s115_s15 }
  0x1a   :  { %121 = dma.hbm_to_vmem [thread:$0]  %s114_s12, 1024, %s116_s15, [#allocation15], %s1393_s16, %s1393_s16, %s1394_s17  }
  0x1b   :  { %1376 = dma.done.wait [#allocation3], 32  }
  0x1c   :  { %1377 = vsyncadd [#allocation3], 4294967264 }
  0x1d   :  { %1378 = dma.done.wait [#allocation6], 160  }
  0x1e   :  { %1379 = vsyncadd [#allocation6], 4294967136 }
  0x1f   :  { %1380 = dma.done.wait [#allocation9], 4128  }
  0x20   :  { %1381 = vsyncadd [#allocation9], 4294963168 }
  0x21   :  { %1382 = dma.done.wait [#allocation12], 3072  }
  0x22   :  { %1383 = vsyncadd [#allocation12], 4294964224 }
  0x23   :  { %1384 = dma.done.wait [#allocation15], 1024  }
  0x24   :  { %1385 = vsyncadd [#allocation15], 4294966272  ;;  %vm175_vm0 = vcmask 1043456   ;;  %v159_v0 = vld [vmem:[#allocation5] sm:$0xff]  ;;  %v157_v1 = vld [vmem:[#allocation2] sm:$0x3] }
  0x25   :  { %vm171_vm1 = vcmask 64512   ;;  %v882_v2 = vld [vmem:[#allocation8 + $0x70] sm:$0xf]  ;;  %v167_v3 = vunpack.c.l.b16 %v159_v0  ;;  %v168_v4 = vunpack.c.h.b16 %v159_v0  ;;  %v1095_v5 = vld [vmem:[#allocation8 + $0x74] sm:$0xf0]  ;;  %v158_v26 = vpack.c.bf16 %v157_v1, %v157_v1  ;;  %s1400_s18 = smov [#allocation16]  }
  0x26   :  { %v946_v6 = vld [vmem:[#allocation8 + $0xf0] sm:$0xf]  ;;  %v1111_v7 = vld [vmem:[#allocation8 + $0xf4] sm:$0xf0]  ;;  %v883_v8 = vor.u32 %v1095_v5, %v882_v2  ;;  %v1094_v10 = vld [vmem:[#allocation8 + $0x74] sm:$0xf] }
  0x27   :  { %v947_v9 = vor.u32 %v1111_v7, %v946_v6  ;;  %v884_v11 = vld [vmem:[#allocation8 + $0x78] sm:$0xf0]  ;;  %v1110_v12 = vld [vmem:[#allocation8 + $0xf4] sm:$0xf]  ;;  %v169_v13 = vpack.c.b16 %v167_v3, %v167_v3  ;;  %v170_v14 = vpack.c.b16 %v168_v4, %v168_v4  ;;  %v874_v17 = vld [vmem:[#allocation8 + $0x60] sm:$0xf] }
  0x28   :  { %v887_v15 = vor.u32 %v1094_v10, %v884_v11  ;;  %v948_v16 = vld [vmem:[#allocation8 + $0xf8] sm:$0xf0]  ;;  %v1093_v18 = vld [vmem:[#allocation8 + $0x64] sm:$0xf0]  ;;  %413 = vmatpush.bf16.msra.mxu2 %v883_v8  ;;  %v938_v21 = vld [vmem:[#allocation8 + $0xe0] sm:$0xf] }
  0x29   :  { %426 = vmatpush.bf16.msra.mxu3 %v947_v9  ;;  %v951_v19 = vor.u32 %v1110_v12, %v948_v16  ;;  %v875_v20 = vor.u32 %v1093_v18, %v874_v17  ;;  %v1109_v22 = vld [vmem:[#allocation8 + $0xe4] sm:$0xf0]  ;;  %v1092_v23 = vld [vmem:[#allocation8 + $0x64] sm:$0xf]  ;;  %v177_v24 = vsel %vm175_vm0, %v169_v13, 0  ;;  %v180_v25 = vsel %vm175_vm0, %v170_v14, 0 }
  0x2a   :  { %v939_v27 = vor.u32 %v1109_v22, %v938_v21  ;;  %v876_v28 = vld [vmem:[#allocation8 + $0x68] sm:$0xf0]  ;;  %v1108_v29 = vld [vmem:[#allocation8 + $0xe4] sm:$0xf]  ;;  %189 = vmatpush.bf16.msra.mxu0 %v177_v24  ;;  %202 = vmatpush.bf16.msra.mxu1 %v180_v25  ;;  %v866_v31 = vld [vmem:[#allocation8 + $0x50] sm:$0xf] }
  0x2b   :  { %v940_v30 = vld [vmem:[#allocation8 + $0xe8] sm:$0xf0]  ;;  %v1091_v32 = vld [vmem:[#allocation8 + $0x54] sm:$0xf0]  ;;  %v879_v33 = vor.u32 %v1092_v23, %v876_v28  ;;  %v930_v35 = vld [vmem:[#allocation8 + $0xd0] sm:$0xf] }
  0x2c   :  { %v943_v34 = vor.u32 %v1108_v29, %v940_v30  ;;  %v1107_v36 = vld [vmem:[#allocation8 + $0xd4] sm:$0xf0]  ;;  %v1090_v37 = vld [vmem:[#allocation8 + $0x54] sm:$0xf]  ;;  %414 = vmatpush.bf16.msra.mxu2 %v875_v20  ;;  %v867_v38 = vor.u32 %v1091_v32, %v866_v31  ;;  %v868_v40 = vld [vmem:[#allocation8 + $0x58] sm:$0xf0] }
  0x2d   :  { %427 = vmatpush.bf16.msra.mxu3 %v939_v27  ;;  %v931_v39 = vor.u32 %v1107_v36, %v930_v35  ;;  %v1106_v41 = vld [vmem:[#allocation8 + $0xd4] sm:$0xf]  ;;  %v932_v42 = vld [vmem:[#allocation8 + $0xd8] sm:$0xf0]  ;;  %822 = vmatmul.msk.bf16.vlgmr.msra.gmra.mxu0 %vm171_vm1, %v158_v26  ;;  %v858_v43 = vld [vmem:[#allocation8 + $0x40] sm:$0xf]  ;;  %v871_v47 = vor.u32 %v1090_v37, %v868_v40 }
  0x2e   :  { %439 = vmatpush.bf16.msrb.mxu0 %v887_v15  ;;  %452 = vmatpush.bf16.msrb.mxu1 %v951_v19  ;;  %v1089_v44 = vld [vmem:[#allocation8 + $0x44] sm:$0xf0]  ;;  %v922_v45 = vld [vmem:[#allocation8 + $0xc0] sm:$0xf]  ;;  %v935_v48 = vor.u32 %v1106_v41, %v932_v42  ;;  %v1088_v49 = vld [vmem:[#allocation8 + $0x44] sm:$0xf] }
  0x2f   :  { %823 = vmatmul.msk.bf16.vlgmr.msra.gmra.mxu1 %vm171_vm1, %v158_v26  ;;  %v1105_v46 = vld [vmem:[#allocation8 + $0xc4] sm:$0xf0]  ;;  %v860_v50 = vld [vmem:[#allocation8 + $0x48] sm:$0xf0]  ;;  %v859_v51 = vor.u32 %v1089_v44, %v858_v43  ;;  %v1104_v53 = vld [vmem:[#allocation8 + $0xc4] sm:$0xf] }
  0x30   :  { %415 = vmatpush.bf16.msra.mxu2 %v867_v38  ;;  %v923_v52 = vor.u32 %v1105_v46, %v922_v45  ;;  %v924_v54 = vld [vmem:[#allocation8 + $0xc8] sm:$0xf0]  ;;  %v850_v55 = vld [vmem:[#allocation8 + $0x30] sm:$0xf]  ;;  %v1087_v56 = vld [vmem:[#allocation8 + $0x34] sm:$0xf0]  ;;  %v863_v60 = vor.u32 %v1088_v49, %v860_v50 }
  0x31   :  { %428 = vmatpush.bf16.msra.mxu3 %v931_v39  ;;  %v914_v57 = vld [vmem:[#allocation8 + $0xb0] sm:$0xf]  ;;  %v1103_v58 = vld [vmem:[#allocation8 + $0xb4] sm:$0xf0]  ;;  %v1086_v59 = vld [vmem:[#allocation8 + $0x34] sm:$0xf]  ;;  %v927_v61 = vor.u32 %v1104_v53, %v924_v54  ;;  %v851_v1 = vor.u32 %v1087_v56, %v850_v55 }
  0x32   :  { %440 = vmatpush.bf16.msrb.mxu0 %v879_v33  ;;  %453 = vmatpush.bf16.msrb.mxu1 %v943_v34  ;;  %v852_v62 = vld [vmem:[#allocation8 + $0x38] sm:$0xf0]  ;;  %v1102_v63 = vld [vmem:[#allocation8 + $0xb4] sm:$0xf]  ;;  %v915_v2 = vor.u32 %v1103_v58, %v914_v57  ;;  %v842_v3 = vld [vmem:[#allocation8 + $0x20] sm:$0xf] }
  0x33   :  { %v916_v0 = vld [vmem:[#allocation8 + $0xb8] sm:$0xf0]  ;;  %v1085_v4 = vld [vmem:[#allocation8 + $0x24] sm:$0xf0]  ;;  %v906_v5 = vld [vmem:[#allocation8 + $0xa0] sm:$0xf]  ;;  %v855_v7 = vor.u32 %v1086_v59, %v852_v62 }
  0x34   :  { %416 = vmatpush.bf16.msra.mxu2 %v859_v51  ;;  %v1101_v6 = vld [vmem:[#allocation8 + $0xa4] sm:$0xf0]  ;;  %v919_v8 = vor.u32 %v1102_v63, %v916_v0  ;;  %v1084_v9 = vld [vmem:[#allocation8 + $0x24] sm:$0xf]  ;;  %v843_v10 = vor.u32 %v1085_v4, %v842_v3  ;;  %v844_v12 = vld [vmem:[#allocation8 + $0x28] sm:$0xf0] }
  0x35   :  { %429 = vmatpush.bf16.msra.mxu3 %v923_v52  ;;  %v907_v11 = vor.u32 %v1101_v6, %v906_v5  ;;  %v1100_v13 = vld [vmem:[#allocation8 + $0xa4] sm:$0xf]  ;;  %v908_v14 = vld [vmem:[#allocation8 + $0xa8] sm:$0xf0]  ;;  %v847_v15 = vor.u32 %v1084_v9, %v844_v12  ;;  %v834_v17 = vld [vmem:[#allocation8 + $0x10] sm:$0xf] }
  0x36   :  { %441 = vmatpush.bf16.msrb.mxu0 %v871_v47  ;;  %454 = vmatpush.bf16.msrb.mxu1 %v935_v48  ;;  %v911_v16 = vor.u32 %v1100_v13, %v908_v14  ;;  %v1083_v18 = vld [vmem:[#allocation8 + $0x14] sm:$0xf0]  ;;  %v898_v19 = vld [vmem:[#allocation8 + $0x90] sm:$0xf]  ;;  %v1082_v22 = vld [vmem:[#allocation8 + $0x14] sm:$0xf] }
  0x37   :  { %v835_v20 = vor.u32 %v1083_v18, %v834_v17  ;;  %v1099_v21 = vld [vmem:[#allocation8 + $0x94] sm:$0xf0]  ;;  %v836_v23 = vld [vmem:[#allocation8 + $0x18] sm:$0xf0]  ;;  %v1098_v26 = vld [vmem:[#allocation8 + $0x94] sm:$0xf] }
  0x38   :  { %417 = vmatpush.bf16.msra.mxu2 %v851_v1  ;;  %v899_v24 = vor.u32 %v1099_v21, %v898_v19  ;;  %v839_v25 = vor.u32 %v1082_v22, %v836_v23  ;;  %v900_v27 = vld [vmem:[#allocation8 + $0x98] sm:$0xf0]  ;;  %v826_v29 = vld [vmem:[#allocation8] sm:$0xf]  ;;  %v1081_v30 = vld [vmem:[#allocation8 + $0x4] sm:$0xf0] }
  0x39   :  { %430 = vmatpush.bf16.msra.mxu3 %v915_v2  ;;  %v903_v28 = vor.u32 %v1098_v26, %v900_v27  ;;  %v890_v31 = vld [vmem:[#allocation8 + $0x80] sm:$0xf]  ;;  %v827_v32 = vor.u32 %v1081_v30, %v826_v29  ;;  %v1097_v33 = vld [vmem:[#allocation8 + $0x84] sm:$0xf0]  ;;  %v1080_v34 = vld [vmem:[#allocation8 + $0x4] sm:$0xf] }
  0x3a   :  { %442 = vmatpush.bf16.msrb.mxu0 %v863_v60  ;;  %455 = vmatpush.bf16.msrb.mxu1 %v927_v61  ;;  %v828_v35 = vld [vmem:[#allocation8 + $0x8] sm:$0xf0]  ;;  %v891_v36 = vor.u32 %v1097_v33, %v890_v31  ;;  %v1096_v38 = vld [vmem:[#allocation8 + $0x84] sm:$0xf]  ;;  %v1127_v41 = vld [vmem:[#allocation11 + $0x78] sm:$0xff]  ;;  %s806_s19 = sshll.u32 %s1400_s18, 4  ;;  %s807_s19 = int_to_ptr.vmem [resolvable:$true] %s806_s19 }
  0x3b   :  { %v831_v37 = vor.u32 %v1080_v34, %v828_v35  ;;  %v892_v39 = vld [vmem:[#allocation8 + $0x88] sm:$0xf0]  ;;  %v1119_v42 = vld [vmem:[#allocation11 + $0x38] sm:$0xff]  ;;  %v1126_v43 = vld [vmem:[#allocation11 + $0x70] sm:$0xff]  ;;  %s808_s5 = sshll.u32 %s1521_s11, 4  ;;  %s809_s5 = int_to_ptr.hbm [resolvable:$true] %s808_s5 }
  0x3c   :  { %418 = vmatpush.bf16.msra.mxu2 %v843_v10  ;;  %v895_v40 = vor.u32 %v1096_v38, %v892_v39  ;;  %v1118_v44 = vld [vmem:[#allocation11 + $0x30] sm:$0xff]  ;;  %v1125_v45 = vld [vmem:[#allocation11 + $0x68] sm:$0xff]  ;;  %v1124_v47 = vld [vmem:[#allocation11 + $0x60] sm:$0xff] }
  0x3d   :  { %431 = vmatpush.bf16.msra.mxu3 %v907_v11  ;;  %v1117_v46 = vld [vmem:[#allocation11 + $0x28] sm:$0xff]  ;;  %v1116_v48 = vld [vmem:[#allocation11 + $0x20] sm:$0xff]  ;;  %v1123_v49 = vld [vmem:[#allocation11 + $0x58] sm:$0xff] }
  0x3e   :  { %443 = vmatpush.bf16.msrb.mxu0 %v855_v7  ;;  %456 = vmatpush.bf16.msrb.mxu1 %v919_v8  ;;  %v160_v50 = vld [vmem:[#allocation7] sm:$0x3]  ;;  %v1122_v51 = vld [vmem:[#allocation11 + $0x50] sm:$0xff]  ;;  %v1121_v1 = vld [vmem:[#allocation11 + $0x48] sm:$0xff] }
  0x3f   :  { %v162_v52 = vperm.slane %v160_v50, 0  ;;  %v163_v53 = vperm.slane %v160_v50, 1  ;;  %v1115_v0 = vld [vmem:[#allocation11 + $0x18] sm:$0xff]  ;;  %v1114_v2 = vld [vmem:[#allocation11 + $0x10] sm:$0xff]  ;;  %v1120_v3 = vld [vmem:[#allocation11 + $0x40] sm:$0xff] }
  0x40   :  { %419 = vmatpush.bf16.msra.mxu2 %v835_v20  ;;  %v1113_v4 = vld [vmem:[#allocation11 + $0x8] sm:$0xff]  ;;  %v1112_v5 = vld [vmem:[#allocation11] sm:$0xff]  ;;  %v1135_v6 = vld [vmem:[#allocation13 + $0x38] sm:$0xff] }
  0x41   :  { %432 = vmatpush.bf16.msra.mxu3 %v899_v24  ;;  %v1134_v7 = vld [vmem:[#allocation13 + $0x30] sm:$0xff]  ;;  %v1133_v8 = vld [vmem:[#allocation13 + $0x28] sm:$0xff]  ;;  %v1132_v9 = vld [vmem:[#allocation13 + $0x20] sm:$0xff] }
  0x42   :  { %444 = vmatpush.bf16.msrb.mxu0 %v847_v15  ;;  %457 = vmatpush.bf16.msrb.mxu1 %v911_v16  ;;  %v247_v10 = vld [vmem:[#allocation10] sm:$0x3]  ;;  %v1130_v30 = vld [vmem:[#allocation13 + $0x10] sm:$0xff]  ;;  %v1129_v31 = vld [vmem:[#allocation13 + $0x8] sm:$0xff] }
  0x43   :  { %v250_v11 = vperm.slane %v247_v10, 1  ;;  %v249_v15 = vperm.slane %v247_v10, 0  ;;  %v1131_v29 = vld [vmem:[#allocation13 + $0x18] sm:$0xff]  ;;  %v1142_v34 = vld [vmem:[#allocation14 + $0x30] sm:$0xff]  ;;  %v1141_v35 = vld [vmem:[#allocation14 + $0x28] sm:$0xff] }
  0x44   :  { %420 = vmatpush.bf16.msra.mxu2 %v827_v32  ;;  %v1128_v32 = vld [vmem:[#allocation13] sm:$0xff]  ;;  %v1143_v33 = vld [vmem:[#allocation14 + $0x38] sm:$0xff]  ;;  %v1138_v39 = vld [vmem:[#allocation14 + $0x10] sm:$0xff] }
  0x45   :  { %433 = vmatpush.bf16.msra.mxu3 %v891_v36  ;;  %v1140_v36 = vld [vmem:[#allocation14 + $0x20] sm:$0xff]  ;;  %v1158_v50 = vld [vmem:[%s1518_s8] ss:$0 sm:$0xff] }
  0x46   :  { %445 = vmatpush.bf16.msrb.mxu0 %v839_v25  ;;  %458 = vmatpush.bf16.msrb.mxu1 %v903_v28 }
  0x48   :  { %604 = vmatpush.bf16.msrb.mxu2 %v1119_v42 }
  0x49   :  { %617 = vmatpush.bf16.msrb.mxu3 %v1127_v41 }
  0x4a   :  { %446 = vmatpush.bf16.msrb.mxu0 %v831_v37  ;;  %459 = vmatpush.bf16.msrb.mxu1 %v895_v40  ;;  %v1139_v37 = vld [vmem:[#allocation14 + $0x18] sm:$0xff]  ;;  %v1157_v40 = vld [vmem:[%s1516_s6] ss:$0 sm:$0xff] }
  0x4c   :  { %605 = vmatpush.bf16.msrb.mxu2 %v1118_v44 }
  0x4d   :  { %618 = vmatpush.bf16.msrb.mxu3 %v1126_v43 }
  0x4e   :  { %702 = vmatpush.bf16.msra.mxu0 %v1135_v6  ;;  %787 = vmatpush.bf16.msra.mxu1 %v1143_v33 }
  0x50   :  { %606 = vmatpush.bf16.msrb.mxu2 %v1117_v46 }
  0x51   :  { %619 = vmatpush.bf16.msrb.mxu3 %v1125_v45 }
  0x52   :  { %703 = vmatpush.bf16.msra.mxu0 %v1134_v7  ;;  %788 = vmatpush.bf16.msra.mxu1 %v1142_v34 }
  0x54   :  { %607 = vmatpush.bf16.msrb.mxu2 %v1116_v48  ;;  %v1137_v48 = vld [vmem:[#allocation14 + $0x8] sm:$0xff] }
  0x55   :  { %620 = vmatpush.bf16.msrb.mxu3 %v1124_v47 }
  0x56   :  { %704 = vmatpush.bf16.msra.mxu0 %v1133_v8  ;;  %789 = vmatpush.bf16.msra.mxu1 %v1141_v35 }
  0x58   :  { %608 = vmatpush.bf16.msrb.mxu2 %v1115_v0 }
  0x59   :  { %621 = vmatpush.bf16.msrb.mxu3 %v1123_v49  ;;  %v1136_v49 = vld [vmem:[#allocation14] sm:$0xff] }
  0x5a   :  { %705 = vmatpush.bf16.msra.mxu0 %v1132_v9  ;;  %790 = vmatpush.bf16.msra.mxu1 %v1140_v36 }
  0x5c   :  { %609 = vmatpush.bf16.msrb.mxu2 %v1114_v2 }
  0x5d   :  { %622 = vmatpush.bf16.msrb.mxu3 %v1122_v51 }
  0x5e   :  { %706 = vmatpush.bf16.msra.mxu0 %v1131_v29  ;;  %791 = vmatpush.bf16.msra.mxu1 %v1139_v37 }
  0x60   :  { %610 = vmatpush.bf16.msrb.mxu2 %v1113_v4 }
  0x61   :  { %623 = vmatpush.bf16.msrb.mxu3 %v1121_v1 }
  0x62   :  { %707 = vmatpush.bf16.msra.mxu0 %v1130_v30  ;;  %792 = vmatpush.bf16.msra.mxu1 %v1138_v39 }
  0x64   :  { %611 = vmatpush.bf16.msrb.mxu2 %v1112_v5 }
  0x65   :  { %624 = vmatpush.bf16.msrb.mxu3 %v1120_v3 }
  0x66   :  { %708 = vmatpush.bf16.msra.mxu0 %v1129_v31  ;;  %793 = vmatpush.bf16.msra.mxu1 %v1137_v48 }
  0x6a   :  { %709 = vmatpush.bf16.msra.mxu0 %v1128_v32  ;;  %794 = vmatpush.bf16.msra.mxu1 %v1136_v49 }
  0xaa   :  { %v191_v54 = vpop.f32.mrf.mxu0 }
  0xab   :  { %v192_v56 = vadd.f32 %v191_v54, %v162_v52 }
  0xac   :  { %v204_v55 = vpop.f32.mrf.mxu1 }
  0xad   :  { %v205_v57 = vadd.f32 %v204_v55, %v163_v53  ;;  %v211_v58 = vmax.f32 %v192_v56, 0.0  ;;  %v1159_v56 = vld [vmem:[%s1520_s10] ss:$0 sm:$0xff] }
  0xaf   :  { %v212_v59 = vmax.f32 %v205_v57, 0.0  ;;  %v213_v60 = vpack.c.bf16 %v211_v58, %v211_v58 }
  0xb1   :  { %v214_v61 = vpack.c.bf16 %v212_v59, %v212_v59  ;;  %421 = vmatmul.bf16.vlgmr.msra.gmra.mxu2 %v213_v60  ;;  %447 = vmatmul.bf16.vlgmr.msrb.gmra.mxu0 %v213_v60 }
  0xb2   :  { %v193_v62 = vpop.f32.mrf.mxu0 }
  0xb3   :  { %434 = vmatmul.bf16.vlgmr.msra.gmra.mxu3 %v214_v61  ;;  %460 = vmatmul.bf16.vlgmr.msrb.gmra.mxu1 %v214_v61 }
  0xb4   :  { %v206_v63 = vpop.f32.mrf.mxu1 }
 0x12e   :  { %v448_v12 = vpop.f32.mrf.mxu0 }
 0x12f   :  { %v449_v14 = vadd.f32 %v448_v12, %v250_v11 }
 0x130   :  { %v461_v13 = vpop.f32.mrf.mxu1 }
 0x131   :  { %v462_v16 = vadd.f32 %v461_v13, %v449_v14 }
 0x133   :  { %v469_v17 = vmax.f32 %v462_v16, 0.0 }
 0x134   :  { %v422_v18 = vpop.f32.mrf.mxu2 }
 0x135   :  { %v423_v20 = vadd.f32 %v422_v18, %v249_v15  ;;  %v471_v21 = vpack.c.bf16 %v469_v17, %v469_v17 }
 0x136   :  { %v435_v19 = vpop.f32.mrf.mxu3  ;;  %v450_v23 = vpop.f32.mrf.mxu0 }
 0x137   :  { %v436_v22 = vadd.f32 %v435_v19, %v423_v20  ;;  %625 = vmatmul.bf16.vlgmr.msrb.gmra.mxu3 %v471_v21 }
 0x138   :  { %v463_v24 = vpop.f32.mrf.mxu1 }
 0x139   :  { %v468_v25 = vmax.f32 %v436_v22, 0.0 }
 0x13b   :  { %v470_v26 = vpack.c.bf16 %v468_v25, %v468_v25 }
 0x13c   :  { %v424_v27 = vpop.f32.mrf.mxu2 }
 0x13d   :  { %612 = vmatmul.bf16.vlgmr.msrb.gmra.mxu2 %v470_v26 }
 0x13e   :  { %v437_v28 = vpop.f32.mrf.mxu3 }
 0x1ba   :  { %v626_v38 = vpop.f32.mrf.mxu3 }
 0x1c0   :  { %v613_v41 = vpop.f32.mrf.mxu2 }
 0x1c1   :  { %v614_v42 = vadd.f32 %v1157_v40, %v613_v41 }
 0x1c2   :  { %v628_v44 = vpop.f32.mrf.mxu3 }
 0x1c3   :  { %v627_v43 = vadd.f32 %v626_v38, %v614_v42 }
 0x1c5   :  { %v632_v45 = vmax.f32 %v627_v43, 0.0 }
 0x1c7   :  { %v633_v46 = vpack.c.bf16 %v632_v45, %v632_v45 }
 0x1c8   :  { %v615_v47 = vpop.f32.mrf.mxu2 }
 0x1c9   :  { %710 = vmatmul.bf16.vlgmr.msra.gmra.mxu0 %v633_v46 }
 0x246   :  { %v711_v51 = vpop.f32.mrf.mxu0 }
 0x247   :  { %v712_v52 = vadd.f32 %v1158_v50, %v711_v51 }
 0x249   :  { %v717_v53 = vmax.f32 %v712_v52, 0.0 }
 0x24b   :  { %v718_v54 = vpack.c.bf16 %v717_v53, %v717_v53 }
 0x24d   :  { %795 = vmatmul.bf16.vlgmr.msra.gmra.mxu1 %v718_v54 }
 0x24e   :  { %v713_v55 = vpop.f32.mrf.mxu0 }
 0x2ca   :  { %v796_v57 = vpop.f32.mrf.mxu1 }
 0x2cb   :  { %v797_v58 = vadd.f32 %v1159_v56, %v796_v57 }
 0x2cd   :  { %800 = vst [vmem:[#allocation16] sm:$0x3] %v797_v58 }
 0x2ce   :  { %811 = dma.vmem_to_hbm [thread:$0]  %s807_s19, 32, %s809_s5, [#allocation4]  }
 0x2d2   :  { %v798_v59 = vpop.f32.mrf.mxu1 }
 0x2d3   :  { %1386 = dma.done.wait [#allocation4], 32  }
 0x2d4   :  { %1387 = vsyncadd [#allocation4], 4294967264 }
 0x2d5   :  { %816 = vsyncpa [#allocation3], 1 }
 0x2d6   :  { %817 = vsyncpa [#allocation6], 1 }
 0x2d7   :  { %818 = vsyncpa [#allocation9], 1 }
 0x2d8   :  { %819 = vsyncpa [#allocation12], 1 }
 0x2d9   :  { %820 = vsyncpa [#allocation15], 1 }
 0x2da   :  { %821 = vsyncpa [#allocation4], 1 }

</bundles_post_ra>
